<compile_context>
chip_gen: v6e
topology: v6e:2x2x1
jax: 0.10.0
libtpu: 0.0.40
codegen_flags: <defaults>
</compile_context>

<pallas_src>
import jax
import jax.numpy as jnp
from jax import lax
from jax.experimental import pallas as pl
from jax.experimental.pallas import tpu as pltpu


# ---------------------------------------------------------------------------
# Numerics helpers
# ---------------------------------------------------------------------------

def _softplus(r):
    """Numerically stable softplus, matching F.softplus threshold behavior."""
    r = r.astype(jnp.float32)
    return jnp.where(r > 20.0, r, jnp.log1p(jnp.exp(jnp.minimum(r, 20.0))))


# ---------------------------------------------------------------------------
# Kernel
# ---------------------------------------------------------------------------

def _bayesian_linear_kernel(x_ref, wmu_ref, wrho_ref, weps_ref, b_ref, o_ref):
    """One (m, n, k) grid step of y = x @ (mu + softplus(rho) * eps).T + bias."""
    k = pl.program_id(2)

    @pl.when(k == 0)
    def _init():
        # Output tile is VMEM-resident across the K ("arbitrary") axis, so seed
        # it with the bias and accumulate straight into it (no acc scratch).
        o_ref[...] = jnp.broadcast_to(b_ref[...].astype(jnp.float32), o_ref.shape)

    # Reparameterized weight sample for this (n, k) block: f32 math on the VPU
    # (softplus goes to the EUP), then cast to bf16 for the MXU's native path.
    sigma = _softplus(wrho_ref[...])
    w = wmu_ref[...].astype(jnp.float32) + sigma * weps_ref[...].astype(jnp.float32)
    w = w.astype(jnp.bfloat16)                                    # (tn, tk)

    # y_tile += x_tile @ w_tile.T without an XLU transpose: contract dim 1 of
    # both operands so W is consumed in its native (out, in) layout.
    o_ref[...] += lax.dot_general(
        x_ref[...], w, (((1,), (1,)), ((), ())),
        preferred_element_type=jnp.float32)


# ---------------------------------------------------------------------------
# Wrapper
# ---------------------------------------------------------------------------

def _round_up(x, m):
    return (x + m - 1) // m * m


def _pad2(a, rows, cols, dtype):
    """Zero-pad a 2-D array to (rows, cols) and cast to `dtype`."""
    out = jnp.zeros((rows, cols), dtype)
    return out.at[:a.shape[0], :a.shape[1]].set(a.astype(dtype))


def bayesian_linear(x, weight_mu, weight_rho, bias_mu, bias_rho, key):
    """Forward of BayesianLinear. x: (B, in_features) -> (B, out_features).

    Returns (y, (eps_w, eps_b)) so callers/tests can rebuild the exact sample.
    """
    B, in_features = x.shape
    out_features, _ = weight_mu.shape
    out_dtype = x.dtype

    k_w, k_b = jax.random.split(key)
    eps_w = jax.random.normal(k_w, (out_features, in_features), dtype=jnp.float32)
    eps_b = jax.random.normal(k_b, (out_features,), dtype=jnp.float32)

    # Bias is tiny: fold mu + softplus(rho) * eps host-side into one vector.
    bias = (bias_mu.astype(jnp.float32)
            + jax.nn.softplus(bias_rho.astype(jnp.float32)) * eps_b)

    # Tile sizes: big enough to amortize per-step overhead, small enough that
    # double-buffered bf16 inputs + f32 output tile stay well under the 32 MiB
    # scoped-VMEM default on all generations (~10 MiB at 512/512/1024).
    tm = min(512, _round_up(B, 16))
    tn = min(512, _round_up(out_features, 128))
    tk = min(1024, _round_up(in_features, 128))
    b_pad = _round_up(B, tm)
    n_pad = _round_up(out_features, tn)
    k_pad = _round_up(in_features, tk)

    # Zero-pad to lane-dense, tile-aligned shapes (bf16 streams for the big
    # arrays).  Padded regions contribute nothing: eps/mu are zero there and
    # padded x columns are zero; padded output rows/cols are sliced off.
    # TODO(synk): the padded/cast parameter copies are rebuilt every call; in a
    # real model they should be cached across forward passes.
    x_p = _pad2(x, b_pad, k_pad, jnp.bfloat16)
    wmu_p = _pad2(weight_mu, n_pad, k_pad, jnp.bfloat16)
    wrho_p = _pad2(weight_rho, n_pad, k_pad, jnp.bfloat16)
    weps_p = _pad2(eps_w, n_pad, k_pad, jnp.bfloat16)
    b_p = _pad2(bias.reshape(1, -1), 1, n_pad, jnp.float32)

    grid = (b_pad // tm, n_pad // tn, k_pad // tk)

    out = pl.pallas_call(
        _bayesian_linear_kernel,
        out_shape=jax.ShapeDtypeStruct((b_pad, n_pad), jnp.float32),
        grid=grid,
        in_specs=[
            pl.BlockSpec((tm, tk), lambda m, n, k: (m, k)),   # x
            pl.BlockSpec((tn, tk), lambda m, n, k: (n, k)),   # weight_mu
            pl.BlockSpec((tn, tk), lambda m, n, k: (n, k)),   # weight_rho
            pl.BlockSpec((tn, tk), lambda m, n, k: (n, k)),   # weight eps
            pl.BlockSpec((1, tn), lambda m, n, k: (0, n)),    # folded bias
        ],
        out_specs=pl.BlockSpec((tm, tn), lambda m, n, k: (m, n)),
        compiler_params=pltpu.CompilerParams(
            dimension_semantics=("parallel", "parallel", "arbitrary")),
    )(x_p, wmu_p, wrho_p, weps_p, b_p)

    y = out[:B, :out_features].astype(out_dtype)
    return y, (eps_w, eps_b)


# ---------------------------------------------------------------------------
# Self-test
# ---------------------------------------------------------------------------

if __name__ == "__main__":
    root = jax.random.PRNGKey(0)
    k_x, k_wmu, k_wrho, k_bmu, k_brho, k_noise = jax.random.split(root, 6)

    batch, input_dim, output_dim = 2, 32, 16

    weight_mu = jax.random.normal(k_wmu, (output_dim, input_dim), dtype=jnp.float32)
    weight_rho = jax.random.normal(k_wrho, (output_dim, input_dim), dtype=jnp.float32)
    bias_mu = jax.random.normal(k_bmu, (output_dim,), dtype=jnp.float32)
    bias_rho = jax.random.normal(k_brho, (output_dim,), dtype=jnp.float32)
    x = jax.random.normal(k_x, (batch, input_dim), dtype=jnp.float32)

    y, (eps_w, eps_b) = bayesian_linear(
        x, weight_mu, weight_rho, bias_mu, bias_rho, k_noise)
    y = jax.block_until_ready(y)
    assert y.shape == (batch, output_dim)
    assert bool(jnp.all(jnp.isfinite(y)))

    bias = bias_mu + jax.nn.softplus(bias_rho) * eps_b

    # Reference that mirrors the kernel's bf16 streaming / bf16-MXU path.
    to32 = lambda a: a.astype(jnp.bfloat16).astype(jnp.float32)
    w_q = (to32(weight_mu)
           + jax.nn.softplus(to32(weight_rho)) * to32(eps_w)).astype(jnp.bfloat16)
    y_ref_q = jnp.dot(x.astype(jnp.bfloat16), w_q.T,
                      preferred_element_type=jnp.float32) + bias
    assert jnp.allclose(y, y_ref_q, atol=5e-2, rtol=1e-2)

    # Loose check against the full-f32 reparameterized reference.
    w_f = weight_mu + jax.nn.softplus(weight_rho) * eps_w
    y_ref = x @ w_f.T + bias
    rel_err = jnp.linalg.norm(y - y_ref) / jnp.linalg.norm(y_ref)
    assert float(rel_err) < 0.05

    # Stable softplus helper matches jax.nn.softplus on ordinary values.
    r = jnp.linspace(-10.0, 30.0, 128).reshape(1, 128)
    assert jnp.allclose(_softplus(r), jax.nn.softplus(r), atol=1e-5)

    print("KERNEL_OK")
</pallas_src>

<mosaic_0001>
module attributes {stable_mosaic.version = 11 : i64} {
  func.func @_bayesian_linear_kernel(%arg0: i32, %arg1: i32, %arg2: i32, %arg3: memref<16x128xbf16, #tpu.memory_space<vmem>>, %arg4: memref<128x128xbf16, #tpu.memory_space<vmem>>, %arg5: memref<128x128xbf16, #tpu.memory_space<vmem>>, %arg6: memref<128x128xbf16, #tpu.memory_space<vmem>>, %arg7: memref<1x128xf32, #tpu.memory_space<vmem>>, %arg8: memref<16x128xf32, #tpu.memory_space<vmem>>) attributes {dimension_semantics = [#tpu.dimension_semantics<parallel>, #tpu.dimension_semantics<parallel>, #tpu.dimension_semantics<arbitrary>], iteration_bounds = array<i64: 1, 1, 1>, scalar_prefetch = 0 : i64, scratch_operands = 0 : i64, tpu.core_type = #tpu.core_type<tc>, window_params = [{transform_indices = @transform_0, window_bounds = array<i64: 16, 128>}, {transform_indices = @transform_1, window_bounds = array<i64: 128, 128>}, {transform_indices = @transform_2, window_bounds = array<i64: 128, 128>}, {transform_indices = @transform_3, window_bounds = array<i64: 128, 128>}, {transform_indices = @transform_4, window_bounds = array<i64: 1, 128>}, {transform_indices = @transform_5, window_bounds = array<i64: 16, 128>}]} {
    %c0_i32 = arith.constant 0 : i32
    %0 = arith.cmpi eq, %arg2, %c0_i32 : i32
    %1 = arith.extui %0 : i1 to i32
    %c0_i32_0 = arith.constant 0 : i32
    %2 = arith.cmpi ne, %1, %c0_i32_0 : i32
    scf.if %2 {
      %c0_14 = arith.constant 0 : index
      %c0_15 = arith.constant 0 : index
      %24 = vector.load %arg7[%c0_14, %c0_15] : memref<1x128xf32, #tpu.memory_space<vmem>>, vector<1x128xf32>
      %25 = vector.shape_cast %24 : vector<1x128xf32> to vector<1x128xf32>
      %26 = vector.broadcast %25 : vector<1x128xf32> to vector<16x128xf32>
      %c0_16 = arith.constant 0 : index
      %c0_17 = arith.constant 0 : index
      %27 = vector.load %arg8[%c0_16, %c0_17] : memref<16x128xf32, #tpu.memory_space<vmem>>, vector<16x128xf32>
      tpu.vector_store %arg8[%c0_16, %c0_17], %26 {strides = array<i32>} : memref<16x128xf32, #tpu.memory_space<vmem>>, vector<16x128xf32>,
    } else {
    }
    %c0 = arith.constant 0 : index
    %c0_1 = arith.constant 0 : index
    %3 = vector.load %arg5[%c0, %c0_1] : memref<128x128xbf16, #tpu.memory_space<vmem>>, vector<128x128xbf16>
    %4 = arith.extf %3 : vector<128x128xbf16> to vector<128x128xf32>
    %cst = arith.constant 2.000000e+01 : f32
    %5 = vector.broadcast %cst : f32 to vector<128x128xf32>
    %6 = arith.cmpf ogt, %4, %5 : vector<128x128xf32>
    %cst_2 = arith.constant 2.000000e+01 : f32
    %7 = vector.broadcast %cst_2 : f32 to vector<128x128xf32>
    %8 = arith.minimumf %4, %7 : vector<128x128xf32>
    %9 = math.exp %8 : vector<128x128xf32>
    %10 = math.log1p %9 : vector<128x128xf32>
    %11 = arith.select %6, %4, %10 : vector<128x128xi1>, vector<128x128xf32>
    %c0_3 = arith.constant 0 : index
    %c0_4 = arith.constant 0 : index
    %12 = vector.load %arg4[%c0_3, %c0_4] : memref<128x128xbf16, #tpu.memory_space<vmem>>, vector<128x128xbf16>
    %13 = arith.extf %12 : vector<128x128xbf16> to vector<128x128xf32>
    %c0_5 = arith.constant 0 : index
    %c0_6 = arith.constant 0 : index
    %14 = vector.load %arg6[%c0_5, %c0_6] : memref<128x128xbf16, #tpu.memory_space<vmem>>, vector<128x128xbf16>
    %15 = arith.extf %14 : vector<128x128xbf16> to vector<128x128xf32>
    %16 = arith.mulf %11, %15 : vector<128x128xf32>
    %17 = arith.addf %13, %16 : vector<128x128xf32>
    %18 = arith.truncf %17 : vector<128x128xf32> to vector<128x128xbf16>
    %c0_7 = arith.constant 0 : index
    %c0_8 = arith.constant 0 : index
    %19 = vector.load %arg8[%c0_7, %c0_8] : memref<16x128xf32, #tpu.memory_space<vmem>>, vector<16x128xf32>
    %c0_9 = arith.constant 0 : index
    %c0_10 = arith.constant 0 : index
    %20 = vector.load %arg3[%c0_9, %c0_10] : memref<16x128xbf16, #tpu.memory_space<vmem>>, vector<16x128xbf16>
    %cst_11 = arith.constant dense<0.000000e+00> : vector<16x128xf32>
    %21 = tpu.matmul %20, %18, %cst_11 {dimension_numbers = #tpu.dot_dimension_numbers<[1], [1], [0], [0], [0, 0, 1, 0], [], []>} : vector<16x128xbf16>, vector<128x128xbf16>, vector<16x128xf32> -> vector<16x128xf32>
    %22 = arith.addf %19, %21 : vector<16x128xf32>
    %c0_12 = arith.constant 0 : index
    %c0_13 = arith.constant 0 : index
    %23 = vector.load %arg8[%c0_12, %c0_13] : memref<16x128xf32, #tpu.memory_space<vmem>>, vector<16x128xf32>
    tpu.vector_store %arg8[%c0_12, %c0_13], %22 {strides = array<i32>} : memref<16x128xf32, #tpu.memory_space<vmem>>, vector<16x128xf32>,
    return
  }
  func.func @transform_0(%arg0: i32, %arg1: i32, %arg2: i32) -> (i32, i32) {
    %c0_i32 = arith.constant 0 : i32
    return %arg0, %arg2 : i32, i32
  }
  func.func @transform_1(%arg0: i32, %arg1: i32, %arg2: i32) -> (i32, i32) {
    %c0_i32 = arith.constant 0 : i32
    return %arg1, %arg2 : i32, i32
  }
  func.func @transform_2(%arg0: i32, %arg1: i32, %arg2: i32) -> (i32, i32) {
    %c0_i32 = arith.constant 0 : i32
    return %arg1, %arg2 : i32, i32
  }
  func.func @transform_3(%arg0: i32, %arg1: i32, %arg2: i32) -> (i32, i32) {
    %c0_i32 = arith.constant 0 : i32
    return %arg1, %arg2 : i32, i32
  }
  func.func @transform_4(%arg0: i32, %arg1: i32, %arg2: i32) -> (i32, i32) {
    %c0_i32 = arith.constant 0 : i32
    %c0_i32_0 = arith.constant 0 : i32
    return %c0_i32, %arg1 : i32, i32
  }
  func.func @transform_5(%arg0: i32, %arg1: i32, %arg2: i32) -> (i32, i32) {
    %c0_i32 = arith.constant 0 : i32
    return %arg0, %arg1 : i32, i32
  }
}

</mosaic_0001>

<bundles_post_ra>
// kernel: tpu_custom_call.1
= control target key start
LH: loop header
LB: loop body
LE: loop exit
PB: predicated region body
PF: predicated region fallthrough
CT: control target
= control target key end

     0   :  { %10 = vsyncpa [#allocation3], 0  ;;  %s1226_s0 = inlined_call_operand.hbm [shape: bf16[16,128], index: 0, kind: input, shape index: {}]   ;;  %s1227_s1 = inlined_call_operand.hbm [shape: bf16[128,128], index: 1, kind: input, shape index: {}]   ;;  %s1228_s2 = inlined_call_operand.hbm [shape: bf16[128,128], index: 2, kind: input, shape index: {}]   ;;  %s1229_s3 = inlined_call_operand.hbm [shape: bf16[128,128], index: 3, kind: input, shape index: {}]   ;;  %s1230_s4 = inlined_call_operand.vmem [shape: f32[1,128], index: 4, kind: input, shape index: {}]   ;;  %s1231_s5 = inlined_call_operand.hbm [shape: f32[16,128], index: 5, kind: output, shape index: {}]  }
   0x1   :  { %11 = vsyncpa [#allocation6], 0 }
   0x2   :  { %12 = vsyncpa [#allocation9], 0 }
   0x3   :  { %13 = vsyncpa [#allocation4], 0  ;;  %s856_s18 = smov [#allocation5]   ;;  %s857_s20 = smov [#allocation2]  }
   0x4   :  { %s31_s19 = sshll.u32 %s856_s18, 4  ;;  %s19_s21 = sshll.u32 %s857_s20, 4  ;;  %s32_s19 = int_to_ptr.vmem [resolvable:$true] %s31_s19  ;;  %s20_s21 = int_to_ptr.vmem [resolvable:$true] %s19_s21 }
   0x5   :  { %s756_s22 = scalar_lea.vmem %s32_s19, 1024  ;;  %p761_p1 = scmp.lt.s32.totalorder %s32_s19, %s32_s19 }
   0x6   :  { %p757_p0 = scmp.ne.s32.totalorder %s32_s19, %s756_s22  ;;  %p762_p2 = scmp.lt.s32.totalorder %s756_s22, %s756_s22 }
   0x8   :  { %p763_p3 = por %p762_p2, %p761_p1 }
   0xa   :  { %p764_p4 = pnand %p763_p3, %p757_p0 }
   0xc   :  { %767 = shalt.err (!%p764_p4)
}
   0xd   :  { %s858_s23 = smov 64   ;;  %s859_s24 = smov 4  }
   0xe   :  { %37 = dma.hbm_to_vmem [thread:$0]  %s1227_s1, 1024, %s32_s19, [#allocation6], %s858_s23, %s858_s23, %s859_s24  }
   0xf   :  { %s776_s27 = scalar_lea.vmem %s20_s21, 128  ;;  %p781_p6 = scmp.lt.s32.totalorder %s20_s21, %s20_s21 }
  0x10   :  { %p777_p5 = scmp.ne.s32.totalorder %s20_s21, %s776_s27  ;;  %p782_p7 = scmp.lt.s32.totalorder %s776_s27, %s776_s27 }
  0x12   :  { %p783_p8 = por %p782_p7, %p781_p6 }
  0x14   :  { %p784_p9 = pnand %p783_p8, %p777_p5 }
  0x16   :  { %787 = shalt.err (!%p784_p9)
}
  0x17   :  { %25 = dma.hbm_to_vmem [thread:$0]  %s1226_s0, 128, %s20_s21, [#allocation3], %s858_s23, %s858_s23, %s859_s24  }
  0x18   :  { %s860_s30 = smov [#allocation7]   ;;  %s861_s7 = smov [#allocation8]  }
  0x19   :  { %s43_s6 = sshll.u32 %s860_s30, 4  ;;  %s55_s8 = sshll.u32 %s861_s7, 4  ;;  %s44_s6 = int_to_ptr.vmem [resolvable:$true] %s43_s6  ;;  %s56_s8 = int_to_ptr.vmem [resolvable:$true] %s55_s8 }
  0x1a   :  { %s796_s1 = scalar_lea.vmem %s44_s6, 1024  ;;  %p801_p11 = scmp.lt.s32.totalorder %s44_s6, %s44_s6 }
  0x1b   :  { %p797_p10 = scmp.ne.s32.totalorder %s44_s6, %s796_s1  ;;  %p802_p12 = scmp.lt.s32.totalorder %s796_s1, %s796_s1 }
  0x1d   :  { %p803_p13 = por %p802_p12, %p801_p11 }
  0x1f   :  { %p804_p0 = pnand %p803_p13, %p797_p10 }
  0x21   :  { %807 = shalt.err (!%p804_p0)
}
  0x22   :  { %49 = dma.hbm_to_vmem [thread:$0]  %s1228_s2, 1024, %s44_s6, [#allocation6], %s858_s23, %s858_s23, %s859_s24  }
  0x23   :  { %s816_s0 = scalar_lea.vmem %s56_s8, 1024  ;;  %p821_p2 = scmp.lt.s32.totalorder %s56_s8, %s56_s8 }
  0x24   :  { %p817_p1 = scmp.ne.s32.totalorder %s56_s8, %s816_s0  ;;  %p822_p3 = scmp.lt.s32.totalorder %s816_s0, %s816_s0 }
  0x26   :  { %p823_p4 = por %p822_p3, %p821_p2 }
  0x28   :  { %p824_p5 = pnand %p823_p4, %p817_p1 }
  0x2a   :  { %827 = shalt.err (!%p824_p5)
}
  0x2b   :  { %61 = dma.hbm_to_vmem [thread:$0]  %s1229_s3, 1024, %s56_s8, [#allocation9], %s858_s23, %s858_s23, %s859_s24  }
  0x2c   :  { %848 = dma.done.wait [#allocation3], 128  }
  0x2d   :  { %849 = vsyncadd [#allocation3], 4294967168 }
  0x2e   :  { %850 = dma.done.wait [#allocation6], 2048  }
  0x2f   :  { %851 = vsyncadd [#allocation6], 4294965248 }
  0x30   :  { %852 = dma.done.wait [#allocation9], 1024  }
  0x31   :  { %853 = vsyncadd [#allocation9], 4294966272  ;;  %v862_v0 = vmov 0.0   ;;  %vm863_vm0 = vmmov 0   ;;  %v628_v1 = vld [vmem:[#allocation7 + $0x38] sm:$0xff]   ;;  %v627_v4 = vld [vmem:[#allocation7 + $0x30] sm:$0xff]  }
  0x32   :  { %652 = vmatprep.subr.bf16.mxu0 %v862_v0  ;;  %668 = vmatprep.mubr.msk.bf16.mxu0 %vm863_vm0, %v862_v0  ;;  %v923_v2 = vunpack.c.l.bf16 %v628_v1  ;;  %v925_v3 = vunpack.c.h.bf16 %v628_v1  ;;  %v927_v5 = vunpack.c.l.bf16 %v627_v4  ;;  %v929_v6 = vunpack.c.h.bf16 %v627_v4  ;;  %v626_v11 = vld [vmem:[#allocation7 + $0x28] sm:$0xff]   ;;  %v625_v18 = vld [vmem:[#allocation7 + $0x20] sm:$0xff]   ;;  %v624_v23 = vld [vmem:[#allocation7 + $0x18] sm:$0xff]   ;;  %s864_s13 = smov [#allocation10]  }
  0x33   :  { %v935_v16 = vunpack.c.l.bf16 %v626_v11  ;;  %v937_v17 = vunpack.c.h.bf16 %v626_v11  ;;  %v941_v21 = vunpack.c.l.bf16 %v625_v18  ;;  %v943_v22 = vunpack.c.h.bf16 %v625_v18  ;;  %v623_v36 = vld [vmem:[#allocation7 + $0x10] sm:$0xff]   ;;  %v955_v38 = vld [vmem:[#allocation5 + $0x38] sm:$0xff]   ;;  %v983_v57 = vld [vmem:[#allocation8 + $0x28] sm:$0xff]   ;;  %s510_s14 = sshll.u32 %s864_s13, 4  ;;  %s511_s14 = int_to_ptr.vmem [resolvable:$true] %s510_s14 }
  0x34   :  { %v152_v7 = vmin.f32 %v923_v2, 20.0  ;;  %v153_v8 = vmin.f32 %v925_v3, 20.0  ;;  %v150_v9 = vmin.f32 %v927_v5, 20.0  ;;  %v151_v10 = vmin.f32 %v929_v6, 20.0  ;;  %v960_v41 = vld [vmem:[#allocation8 + $0x38] sm:$0xff]   ;;  %v965_v44 = vld [vmem:[#allocation5 + $0x30] sm:$0xff]   ;;  %p833_p7 = scmp.lt.s32.totalorder %s511_s14, %s511_s14 }
  0x35   :  { %v148_v19 = vmin.f32 %v935_v16, 20.0  ;;  %v149_v20 = vmin.f32 %v937_v17, 20.0  ;;  %v146_v26 = vmin.f32 %v941_v21, 20.0  ;;  %v147_v27 = vmin.f32 %v943_v22, 20.0  ;;  %v974_v50 = vld [vmem:[#allocation8 + $0x30] sm:$0xff]   ;;  %s828_s15 = scalar_lea.vmem %s511_s14, 256 }
  0x36   :  { %v182_v12 = vmul.f32 1.442695, %v152_v7  ;;  %v184_v13 = vmul.f32 1.442695, %v153_v8  ;;  %v178_v14 = vmul.f32 1.442695, %v150_v9  ;;  %v947_v28 = vunpack.c.l.bf16 %v624_v23  ;;  %p829_p6 = scmp.ne.s32.totalorder %s511_s14, %s828_s15  ;;  %p834_p8 = scmp.lt.s32.totalorder %s828_s15, %s828_s15 }
  0x37   :  { %v180_v15 = vmul.f32 1.442695, %v151_v10  ;;  %v174_v24 = vmul.f32 1.442695, %v148_v19  ;;  %v176_v25 = vmul.f32 1.442695, %v149_v20  ;;  %v949_v30 = vunpack.c.h.bf16 %v624_v23 }
  0x38   :  { %684 = vpow2.f32 %v182_v12  ;;  %v170_v29 = vmul.f32 1.442695, %v146_v26  ;;  %v172_v31 = vmul.f32 1.442695, %v147_v27  ;;  %v144_v32 = vmin.f32 %v947_v28, 20.0  ;;  %p835_p9 = por %p834_p8, %p833_p7 }
  0x39   :  { %686 = vpow2.f32 %v184_v13  ;;  %v145_v33 = vmin.f32 %v949_v30, 20.0  ;;  %v967_v45 = vunpack.c.l.bf16 %v623_v36  ;;  %v588_v47 = vunpack.c.l.bf16 %v955_v38 }
  0x3a   :  { %688 = vpow2.f32 %v178_v14  ;;  %v166_v34 = vmul.f32 1.442695, %v144_v32  ;;  %v589_v48 = vunpack.c.h.bf16 %v955_v38  ;;  %v620_v51 = vunpack.c.l.bf16 %v960_v41  ;;  %p836_p10 = pnand %p835_p9, %p829_p6 }
  0x3b   :  { %690 = vpow2.f32 %v180_v15  ;;  %v168_v35 = vmul.f32 1.442695, %v145_v33  ;;  %v621_v52 = vunpack.c.h.bf16 %v960_v41  ;;  %v978_v53 = vunpack.c.h.bf16 %v623_v36 }
  0x3c   :  { %692 = vpow2.f32 %v174_v24  ;;  %v584_v55 = vunpack.c.l.bf16 %v965_v44  ;;  %v585_v56 = vunpack.c.h.bf16 %v965_v44  ;;  %v616_v60 = vunpack.c.l.bf16 %v974_v50 }
  0x3d   :  { %694 = vpow2.f32 %v176_v25  ;;  %v617_v61 = vunpack.c.h.bf16 %v974_v50  ;;  %v142_v62 = vmin.f32 %v967_v45, 20.0  ;;  %v612_v9 = vunpack.c.l.bf16 %v983_v57 }
  0x3e   :  { %696 = vpow2.f32 %v170_v29  ;;  %v613_v10 = vunpack.c.h.bf16 %v983_v57  ;;  %v143_v11 = vmin.f32 %v978_v53, 20.0  ;;  %vm136_vm1 = vcmp.gt.f32.partialorder %v923_v2, 20.0 }
  0x3f   :  { %698 = vpow2.f32 %v172_v31  ;;  %vm137_vm2 = vcmp.gt.f32.partialorder %v925_v3, 20.0  ;;  %v162_v24 = vmul.f32 1.442695, %v142_v62  ;;  %vm134_vm3 = vcmp.gt.f32.partialorder %v927_v5, 20.0 }
  0x40   :  { %700 = vpow2.f32 %v166_v34  ;;  %vm135_vm4 = vcmp.gt.f32.partialorder %v929_v6, 20.0  ;;  %vm132_vm10 = vcmp.gt.f32.partialorder %v935_v16, 20.0  ;;  %vm133_vm12 = vcmp.gt.f32.partialorder %v937_v17, 20.0 }
  0x41   :  { %702 = vpow2.f32 %v168_v35  ;;  %vm130_vm15 = vcmp.gt.f32.partialorder %v941_v21, 20.0  ;;  %vm131_vm0 = vcmp.gt.f32.partialorder %v943_v22, 20.0 }
  0x45   :  { %v953_v37 = vpop.eup %684 }
  0x46   :  { %v957_v39 = vpop.eup %686  ;;  %v312_v40 = vadd.f32 1.0, %v953_v37  ;;  %v315_v59 = vmul.f32 -0.5, %v953_v37  ;;  %v318_v13 = vand.u32 2147483647, %v953_v37 }
  0x47   :  { %v962_v42 = vpop.eup %688  ;;  %v321_v43 = vadd.f32 1.0, %v957_v39  ;;  %v324_v1 = vmul.f32 -0.5, %v957_v39  ;;  %v327_v20 = vand.u32 2147483647, %v957_v39 }
  0x48   :  { %v969_v46 = vpop.eup %690  ;;  %704 = vlog2.f32 %v312_v40  ;;  %v294_v49 = vadd.f32 1.0, %v962_v42  ;;  %v297_v4 = vmul.f32 -0.5, %v962_v42  ;;  %v316_v19 = vadd.f32 1.0, %v315_v59 }
  0x49   :  { %706 = vlog2.f32 %v321_v43  ;;  %v303_v54 = vadd.f32 1.0, %v969_v46  ;;  %v693_v58 = vpop.eup %692  ;;  %v306_v8 = vmul.f32 -0.5, %v969_v46  ;;  %v325_v25 = vadd.f32 1.0, %v324_v1 }
  0x4a   :  { %708 = vlog2.f32 %v294_v49  ;;  %v989_v63 = vpop.eup %694  ;;  %v276_v7 = vadd.f32 1.0, %v693_v58  ;;  %v279_v14 = vmul.f32 -0.5, %v693_v58  ;;  %v298_v26 = vadd.f32 1.0, %v297_v4 }
  0x4b   :  { %710 = vlog2.f32 %v303_v54  ;;  %v997_v12 = vpop.eup %696  ;;  %v285_v15 = vadd.f32 1.0, %v989_v63  ;;  %v300_v27 = vand.u32 2147483647, %v962_v42  ;;  %v307_v31 = vadd.f32 1.0, %v306_v8 }
  0x4c   :  { %712 = vlog2.f32 %v276_v7  ;;  %v1002_v18 = vpop.eup %698  ;;  %v258_v23 = vadd.f32 1.0, %v997_v12  ;;  %v309_v32 = vand.u32 2147483647, %v969_v46  ;;  %v282_v33 = vand.u32 2147483647, %v693_v58 }
  0x4d   :  { %714 = vlog2.f32 %v285_v15  ;;  %v1009_v29 = vpop.eup %700  ;;  %v267_v34 = vadd.f32 1.0, %v1002_v18  ;;  %v280_v35 = vadd.f32 1.0, %v279_v14  ;;  %v288_v36 = vmul.f32 -0.5, %v989_v63 }
  0x4e   :  { %716 = vlog2.f32 %v258_v23  ;;  %v164_v40 = vmul.f32 1.442695, %v143_v11  ;;  %vm1015_vm5 = vcmp.lt.f32.partialorder %v318_v13, 0.0004427343  ;;  %v291_v49 = vand.u32 2147483647, %v989_v63  ;;  %v1021_v59 = vpop.eup %702 }
  0x4f   :  { %718 = vlog2.f32 %v267_v34  ;;  %v240_v54 = vadd.f32 1.0, %v1009_v29  ;;  %v317_v62 = vmul.f32 %v953_v37, %v316_v19  ;;  %v326_v1 = vmul.f32 %v957_v39, %v325_v25 }
  0x50   :  { %vm1025_vm6 = vcmp.lt.f32.partialorder %v327_v20, 0.0004427343  ;;  %vm1029_vm7 = vcmp.lt.f32.partialorder %v300_v27, 0.0004427343  ;;  %v299_v11 = vmul.f32 %v962_v42, %v298_v26  ;;  %v308_v13 = vmul.f32 %v969_v46, %v307_v31 }
  0x51   :  { %vm1035_vm8 = vcmp.lt.f32.partialorder %v309_v32, 0.0004427343  ;;  %vm1039_vm9 = vcmp.lt.f32.partialorder %v282_v33, 0.0004427343  ;;  %v281_v19 = vmul.f32 %v693_v58, %v280_v35  ;;  %v289_v20 = vadd.f32 1.0, %v288_v36  ;;  %v622_v32 = vld [vmem:[#allocation7 + $0x8] sm:$0xff]  }
  0x52   :  { %v261_v23 = vmul.f32 -0.5, %v997_v12  ;;  %vm1045_vm11 = vcmp.lt.f32.partialorder %v291_v49, 0.0004427343  ;;  %720 = vlog2.f32 %v240_v54  ;;  %v249_v46 = vadd.f32 1.0, %v1021_v59 }
  0x53   :  { %v264_v58 = vand.u32 2147483647, %v997_v12  ;;  %722 = vpow2.f32 %v162_v24  ;;  %v270_v36 = vmul.f32 -0.5, %v1002_v18  ;;  %v290_v7 = vmul.f32 %v989_v63, %v289_v20 }
  0x54   :  { %724 = vpow2.f32 %v164_v40  ;;  %v1071_v40 = vunpack.c.l.bf16 %v622_v32  ;;  %v243_v20 = vmul.f32 -0.5, %v1009_v29  ;;  %v252_v44 = vmul.f32 -0.5, %v1021_v59 }
  0x55   :  { %v705_v8 = vpop.eup %704  ;;  %726 = vlog2.f32 %v249_v46  ;;  %v271_v14 = vadd.f32 1.0, %v270_v36  ;;  %vm1095_vm13 = vcmp.lt.f32.partialorder %v264_v58, 0.0004427343 }
  0x56   :  { %v707_v39 = vpop.eup %706  ;;  %v314_v15 = vmul.f32 0.6931472, %v705_v8  ;;  %v253_v57 = vadd.f32 1.0, %v252_v44 }
  0x57   :  { %v709_v25 = vpop.eup %708  ;;  %v323_v27 = vmul.f32 0.6931472, %v707_v39 }
  0x58   :  { %v320_v26 = vsel %vm1015_vm5, %v317_v62, %v314_v15  ;;  %v296_v31 = vmul.f32 0.6931472, %v709_v25  ;;  %v711_v33 = vpop.eup %710 }
  0x59   :  { %v329_v34 = vsel %vm1025_vm6, %v326_v1, %v323_v27  ;;  %v344_v35 = vsel %vm136_vm1, %v923_v2, %v320_v26  ;;  %v305_v54 = vmul.f32 0.6931472, %v711_v33  ;;  %v713_v62 = vpop.eup %712  ;;  %v1106_v27 = vld [vmem:[#allocation5 + $0x20] sm:$0xff]   ;;  %vm126_vm6 = vcmp.gt.f32.partialorder %v967_v45, 20.0 }
  0x5a   :  { %v345_v43 = vsel %vm137_vm2, %v925_v3, %v329_v34  ;;  %v424_v49 = vmul.f32 %v620_v51, %v344_v35  ;;  %v302_v24 = vsel %vm1029_vm7, %v299_v11, %v296_v31  ;;  %v278_v4 = vmul.f32 0.6931472, %v713_v62  ;;  %v715_v8 = vpop.eup %714 }
  0x5b   :  { %v425_v1 = vmul.f32 %v621_v52, %v345_v43  ;;  %v342_v2 = vsel %vm134_vm3, %v927_v5, %v302_v24  ;;  %v311_v51 = vsel %vm1035_vm8, %v308_v13, %v305_v54  ;;  %v262_v11 = vadd.f32 1.0, %v261_v23  ;;  %v717_v63 = vpop.eup %716  ;;  %v633_v23 = vld [vmem:[#allocation5 + $0x28] sm:$0xff]   ;;  %v639_v43 = vld [vmem:[#allocation8 + $0x20] sm:$0xff]  }
  0x5c   :  { %v440_v3 = vadd.f32 %v588_v47, %v424_v49  ;;  %v343_v5 = vsel %vm135_vm4, %v929_v6, %v311_v51  ;;  %v422_v52 = vmul.f32 %v616_v60, %v342_v2  ;;  %v287_v13 = vmul.f32 0.6931472, %v715_v8  ;;  %v719_v15 = vpop.eup %718 }
  0x5d   :  { %v441_v41 = vadd.f32 %v589_v48, %v425_v1  ;;  %v423_v47 = vmul.f32 %v617_v61, %v343_v5  ;;  %v284_v38 = vsel %vm1039_vm9, %v281_v19, %v278_v4  ;;  %v1090_v48 = vunpack.c.h.bf16 %v622_v32 }
  0x5e   :  { %v140_v6 = vmin.f32 %v1071_v40, 20.0  ;;  %v293_v60 = vsel %vm1045_vm11, %v290_v7, %v287_v13  ;;  %v273_v61 = vand.u32 2147483647, %v1002_v18  ;;  %v438_v37 = vadd.f32 %v584_v55, %v422_v52  ;;  %v527_v52 = vld [vmem:[#allocation7] sm:$0xff]  }
  0x5f   :  { %v449_v39 = vpack.c.bf16 %v441_v41, %v440_v3  ;;  %v439_v19 = vadd.f32 %v585_v56, %v423_v47  ;;  %v263_v25 = vmul.f32 %v997_v12, %v262_v11  ;;  %v340_v46 = vsel %vm132_vm10, %v935_v16, %v284_v38  ;;  %v721_v58 = vpop.eup %720 }
  0x60   :  { %v158_v42 = vmul.f32 1.442695, %v140_v6  ;;  %v341_v26 = vsel %vm133_vm12, %v937_v17, %v293_v60  ;;  %v260_v55 = vmul.f32 0.6931472, %v717_v63  ;;  %v269_v56 = vmul.f32 0.6931472, %v719_v15  ;;  %v1123_v35 = vpop.eup %722 }
  0x61   :  { %653 = vmatpush3.bf16.xpose.msra.mxu0 %v449_v39  ;;  %v272_v31 = vmul.f32 %v1002_v18, %v271_v14  ;;  %v141_v12 = vmin.f32 %v1090_v48, 20.0  ;;  %v580_v32 = vunpack.c.l.bf16 %v633_v23  ;;  %v581_v33 = vunpack.c.h.bf16 %v633_v23  ;;  %v1130_v49 = vpop.eup %724  ;;  %v638_v6 = vld [vmem:[#allocation8 + $0x18] sm:$0xff]  }
  0x62   :  { %654 = vmatprep.subr.bf16.mxu0 %v862_v0  ;;  %728 = vpow2.f32 %v158_v42  ;;  %vm1118_vm14 = vcmp.lt.f32.partialorder %v273_v61, 0.0004427343  ;;  %v576_v16 = vunpack.c.l.bf16 %v1106_v27  ;;  %v448_v17 = vpack.c.bf16 %v439_v19, %v438_v37  ;;  %v727_v2 = vpop.eup %726 }
  0x63   :  { %v420_v36 = vmul.f32 %v612_v9, %v340_v46  ;;  %v421_v18 = vmul.f32 %v613_v10, %v341_v26  ;;  %v266_v24 = vsel %vm1095_vm13, %v263_v25, %v260_v55  ;;  %v244_v54 = vadd.f32 1.0, %v243_v20 }
  0x64   :  { %v246_v62 = vand.u32 2147483647, %v1009_v29  ;;  %v222_v1 = vadd.f32 1.0, %v1123_v35  ;;  %v275_v9 = vsel %vm1118_vm14, %v272_v31, %v269_v56  ;;  %v160_v10 = vmul.f32 1.442695, %v141_v12  ;;  %v631_v56 = vld [vmem:[#allocation5 + $0x18] sm:$0xff]  }
  0x65   :  { %v608_v3 = vunpack.c.l.bf16 %v639_v43  ;;  %v255_v51 = vand.u32 2147483647, %v1021_v59  ;;  %v231_v4 = vadd.f32 1.0, %v1130_v49  ;;  %v436_v7 = vadd.f32 %v580_v32, %v420_v36 }
  0x66   :  { %730 = vlog2.f32 %v222_v1  ;;  %v437_v8 = vadd.f32 %v581_v33, %v421_v18  ;;  %v338_v41 = vsel %vm130_vm15, %v941_v21, %v266_v24  ;;  %v609_v5 = vunpack.c.h.bf16 %v639_v43  ;;  %v637_v1 = vld [vmem:[#allocation8 + $0x10] sm:$0xff]  }
  0x67   :  { %v339_v11 = vsel %vm131_vm0, %v943_v22, %v275_v9  ;;  %v245_v47 = vmul.f32 %v1009_v29, %v244_v54  ;;  %vm1149_vm1 = vcmp.lt.f32.partialorder %v246_v62, 0.0004427343  ;;  %732 = vlog2.f32 %v231_v4 }
  0x68   :  { %v242_v14 = vmul.f32 0.6931472, %v721_v58  ;;  %v251_v63 = vmul.f32 0.6931472, %v727_v2  ;;  %v254_v39 = vmul.f32 %v1021_v59, %v253_v57  ;;  %734 = vpow2.f32 %v160_v10 }
  0x69   :  { %655 = vmatpush3.bf16.xpose.msra.mxu0 %v448_v17  ;;  %v418_v21 = vmul.f32 %v608_v3, %v338_v41  ;;  %vm1154_vm2 = vcmp.lt.f32.partialorder %v255_v51, 0.0004427343  ;;  %v225_v22 = vmul.f32 -0.5, %v1123_v35  ;;  %v1159_v15 = vunpack.c.l.bf16 %v527_v52 }
  0x6a   :  { %656 = vmatprep.subr.bf16.mxu0 %v862_v0  ;;  %v447_v29 = vpack.c.bf16 %v437_v8, %v436_v7  ;;  %v577_v60 = vunpack.c.h.bf16 %v1106_v27  ;;  %v419_v50 = vmul.f32 %v609_v5, %v339_v11  ;;  %v1162_v61 = vunpack.c.h.bf16 %v527_v52 }
  0x6b   :  { %vm128_vm3 = vcmp.gt.f32.partialorder %v947_v28, 20.0  ;;  %vm129_vm4 = vcmp.gt.f32.partialorder %v949_v30, 20.0  ;;  %v234_v59 = vmul.f32 -0.5, %v1130_v49  ;;  %v138_v20 = vmin.f32 %v1159_v15, 20.0 }
  0x6c   :  { %v248_v37 = vsel %vm1149_vm1, %v245_v47, %v242_v14  ;;  %v257_v19 = vsel %vm1154_vm2, %v254_v39, %v251_v63  ;;  %v604_v23 = vunpack.c.l.bf16 %v638_v6  ;;  %v139_v25 = vmin.f32 %v1162_v61, 20.0 }
  0x6d   :  { %v434_v42 = vadd.f32 %v576_v16, %v418_v21  ;;  %v605_v46 = vunpack.c.h.bf16 %v638_v6  ;;  %v226_v26 = vadd.f32 1.0, %v225_v22  ;;  %v154_v55 = vmul.f32 1.442695, %v138_v20 }
  0x6e   :  { %v435_v44 = vadd.f32 %v577_v60, %v419_v50  ;;  %v228_v31 = vand.u32 2147483647, %v1123_v35  ;;  %v156_v58 = vmul.f32 1.442695, %v139_v25  ;;  %v336_v32 = vsel %vm128_vm3, %v947_v28, %v248_v37 }
  0x6f   :  { %v729_v27 = vpop.eup %728  ;;  %v337_v33 = vsel %vm129_vm4, %v949_v30, %v257_v19  ;;  %v235_v34 = vadd.f32 1.0, %v234_v59  ;;  %736 = vpow2.f32 %v154_v55  ;;  %v237_v16 = vand.u32 2147483647, %v1130_v49 }
  0x70   :  { %v204_v12 = vadd.f32 1.0, %v729_v27  ;;  %v572_v17 = vunpack.c.l.bf16 %v631_v56  ;;  %v573_v36 = vunpack.c.h.bf16 %v631_v56  ;;  %v227_v18 = vmul.f32 %v1123_v35, %v226_v26  ;;  %v629_v56 = vld [vmem:[#allocation5 + $0x8] sm:$0xff]  }
  0x71   :  { %657 = vmatpush3.bf16.xpose.msra.mxu0 %v447_v29  ;;  %v446_v24 = vpack.c.bf16 %v435_v44, %v434_v42  ;;  %v416_v54 = vmul.f32 %v604_v23, %v336_v32  ;;  %v417_v62 = vmul.f32 %v605_v46, %v337_v33  ;;  %vm1183_vm5 = vcmp.lt.f32.partialorder %v228_v31, 0.0004427343  ;;  %v636_v23 = vld [vmem:[#allocation8 + $0x8] sm:$0xff]  }
  0x72   :  { %658 = vmatprep.subr.bf16.mxu0 %v862_v0  ;;  %738 = vlog2.f32 %v204_v12  ;;  %v236_v9 = vmul.f32 %v1130_v49, %v235_v34  ;;  %vm1189_vm7 = vcmp.lt.f32.partialorder %v237_v16, 0.0004427343  ;;  %v207_v35 = vmul.f32 -0.5, %v729_v27  ;;  %v630_v49 = vld [vmem:[#allocation5 + $0x10] sm:$0xff]  }
  0x73   :  { %740 = vpow2.f32 %v156_v58  ;;  %v731_v43 = vpop.eup %730  ;;  %vm127_vm8 = vcmp.gt.f32.partialorder %v978_v53, 20.0  ;;  %v600_v4 = vunpack.c.l.bf16 %v637_v1  ;;  %v432_v7 = vadd.f32 %v572_v17, %v416_v54 }
  0x74   :  { %v224_v30 = vmul.f32 0.6931472, %v731_v43  ;;  %v733_v57 = vpop.eup %732  ;;  %v433_v8 = vadd.f32 %v573_v36, %v417_v62  ;;  %v601_v41 = vunpack.c.h.bf16 %v637_v1  ;;  %v208_v13 = vadd.f32 1.0, %v207_v35 }
  0x75   :  { %v735_v2 = vpop.eup %734  ;;  %v233_v51 = vmul.f32 0.6931472, %v733_v57  ;;  %v568_v14 = vunpack.c.l.bf16 %v630_v49  ;;  %v210_v63 = vand.u32 2147483647, %v729_v27  ;;  %v569_v21 = vunpack.c.h.bf16 %v630_v49  ;;  %v559_v57 = vld [vmem:[#allocation5] sm:$0xff]  }
  0x76   :  { %v230_v3 = vsel %vm1183_vm5, %v227_v18, %v224_v30  ;;  %v213_v5 = vadd.f32 1.0, %v735_v2  ;;  %v445_v39 = vpack.c.bf16 %v433_v8, %v432_v7  ;;  %v209_v29 = vmul.f32 %v729_v27, %v208_v13  ;;  %v591_v30 = vld [vmem:[#allocation8] sm:$0xff]  }
  0x77   :  { %v239_v52 = vsel %vm1189_vm7, %v236_v9, %v233_v51  ;;  %v334_v11 = vsel %vm126_vm6, %v967_v45, %v230_v3  ;;  %v216_v60 = vmul.f32 -0.5, %v735_v2  ;;  %vm1203_vm9 = vcmp.lt.f32.partialorder %v210_v63, 0.0004427343 }
  0x78   :  { %v335_v47 = vsel %vm127_vm8, %v978_v53, %v239_v52  ;;  %742 = vlog2.f32 %v213_v5  ;;  %v414_v38 = vmul.f32 %v600_v4, %v334_v11  ;;  %vm124_vm10 = vcmp.gt.f32.partialorder %v1071_v40, 20.0 }
  0x79   :  { %659 = vmatpush3.bf16.xpose.msra.mxu0 %v446_v24  ;;  %v415_v6 = vmul.f32 %v601_v41, %v335_v47  ;;  %v217_v42 = vadd.f32 1.0, %v216_v60  ;;  %v219_v46 = vand.u32 2147483647, %v735_v2  ;;  %v596_v55 = vunpack.c.l.bf16 %v636_v23 }
  0x7a   :  { %660 = vmatprep.subr.bf16.mxu0 %v862_v0  ;;  %v430_v53 = vadd.f32 %v568_v14, %v414_v38  ;;  %vm125_vm11 = vcmp.gt.f32.partialorder %v1090_v48, 20.0  ;;  %v564_v34 = vunpack.c.l.bf16 %v629_v56  ;;  %v597_v16 = vunpack.c.h.bf16 %v636_v23  ;;  %v683_v38 = vld [vmem:[#allocation2] sm:$0xff]  }
  0x7b   :  { %v431_v37 = vadd.f32 %v569_v21, %v415_v6  ;;  %v218_v12 = vmul.f32 %v735_v2, %v217_v42  ;;  %vm220_vm12 = vcmp.lt.f32.partialorder %v219_v46, 0.0004427343  ;;  %v565_v43 = vunpack.c.h.bf16 %v629_v56  ;;  %v524_v6 = vld [vmem:[%s1230_s4] ss:$0 sm:$0xff] }
  0x7c   :  { %v737_v22 = vpop.eup %736  ;;  %vm122_vm14 = vcmp.gt.f32.partialorder %v1159_v15, 20.0  ;;  %v592_v51 = vunpack.c.l.bf16 %v591_v30  ;;  %v560_v8 = vunpack.c.l.bf16 %v559_v57  ;;  %vm123_vm0 = vcmp.gt.f32.partialorder %v1162_v61, 20.0 }
  0x7d   :  { %v186_v20 = vadd.f32 1.0, %v737_v22  ;;  %v444_v26 = vpack.c.bf16 %v431_v37, %v430_v53  ;;  %v189_v31 = vmul.f32 -0.5, %v737_v22  ;;  %v192_v24 = vand.u32 2147483647, %v737_v22 }
  0x7e   :  { %v593_v41 = vunpack.c.h.bf16 %v591_v30  ;;  %v561_v11 = vunpack.c.h.bf16 %v559_v57 }
  0x7f   :  { %v739_v50 = vpop.eup %738  ;;  %744 = vlog2.f32 %v186_v20  ;;  %v190_v36 = vadd.f32 1.0, %v189_v31  ;;  %vm193_vm13 = vcmp.lt.f32.partialorder %v192_v24, 0.0004427343 }
  0x80   :  { %v741_v45 = vpop.eup %740  ;;  %v206_v19 = vmul.f32 0.6931472, %v739_v50 }
  0x81   :  { %661 = vmatpush3.bf16.xpose.msra.mxu0 %v445_v39  ;;  %v195_v25 = vadd.f32 1.0, %v741_v45  ;;  %v198_v32 = vmul.f32 -0.5, %v741_v45  ;;  %v201_v1 = vand.u32 2147483647, %v741_v45  ;;  %v191_v9 = vmul.f32 %v737_v22, %v190_v36 }
  0x82   :  { %662 = vmatprep.subr.bf16.mxu0 %v862_v0  ;;  %v212_v27 = vsel %vm1203_vm9, %v209_v29, %v206_v19 }
  0x83   :  { %746 = vlog2.f32 %v195_v25  ;;  %v332_v44 = vsel %vm124_vm10, %v1071_v40, %v212_v27  ;;  %v199_v54 = vadd.f32 1.0, %v198_v32  ;;  %vm202_vm15 = vcmp.lt.f32.partialorder %v201_v1, 0.0004427343 }
  0x84   :  { %v412_v17 = vmul.f32 %v596_v55, %v332_v44 }
  0x85   :  { %v743_v58 = vpop.eup %742  ;;  %v200_v3 = vmul.f32 %v741_v45, %v199_v54 }
  0x86   :  { %v215_v33 = vmul.f32 0.6931472, %v743_v58  ;;  %v428_v28 = vadd.f32 %v564_v34, %v412_v17 }
  0x88   :  { %v221_v18 = vsel %vm220_vm12, %v218_v12, %v215_v33 }
  0x89   :  { %663 = vmatpush3.bf16.xpose.msra.mxu0 %v444_v26  ;;  %v333_v40 = vsel %vm125_vm11, %v1090_v48, %v221_v18 }
  0x8a   :  { %664 = vmatprep.subr.bf16.mxu0 %v862_v0  ;;  %v413_v62 = vmul.f32 %v597_v16, %v333_v40 }
  0x8c   :  { %v745_v10 = vpop.eup %744  ;;  %v429_v35 = vadd.f32 %v565_v43, %v413_v62 }
  0x8d   :  { %v188_v2 = vmul.f32 0.6931472, %v745_v10 }
  0x8e   :  { %v443_v7 = vpack.c.bf16 %v429_v35, %v428_v28 }
  0x8f   :  { %v194_v48 = vsel %vm193_vm13, %v191_v9, %v188_v2 }
  0x90   :  { %v747_v4 = vpop.eup %746  ;;  %v330_v5 = vsel %vm122_vm14, %v1159_v15, %v194_v48 }
  0x91   :  { %v197_v49 = vmul.f32 0.6931472, %v747_v4  ;;  %665 = vmatpush3.bf16.xpose.msra.mxu0 %v443_v7  ;;  %v410_v47 = vmul.f32 %v592_v51, %v330_v5 }
  0x92   :  { %666 = vmatprep.subr.bf16.mxu0 %v862_v0 }
  0x93   :  { %v203_v52 = vsel %vm202_vm15, %v200_v3, %v197_v49  ;;  %v426_v63 = vadd.f32 %v560_v8, %v410_v47 }
  0x94   :  { %v331_v13 = vsel %vm123_vm0, %v1162_v61, %v203_v52 }
  0x95   :  { %v411_v14 = vmul.f32 %v593_v41, %v331_v13 }
  0x97   :  { %v427_v39 = vadd.f32 %v561_v11, %v411_v14 }
  0x99   :  { %v442_v21 = vpack.c.bf16 %v427_v39, %v426_v63 }
  0x9b   :  { %667 = vmatpush3.bf16.xpose.msra.mxu0 %v442_v21 }
  0xa2   :  { %669 = vmatmul.mubr.bf16.vlgmr.msra.gmra.mxu0 %v683_v38 }
 0x162   :  { %v494_v22 = vpop.f32.mrf.mxu0 }
 0x163   :  { %v501_v15 = vadd.f32 %v524_v6, %v494_v22 }
 0x164   :  { %v670_v0 = vpop.f32.mrf.mxu0 }
 0x165   :  { %503 = vst [vmem:[#allocation10] sm:$0xff] %v501_v15 }
 0x166   :  { %v497_v29 = vpop.f32.mrf.mxu0 }
 0x167   :  { %v502_v61 = vadd.f32 %v524_v6, %v497_v29 }
 0x168   :  { %v671_v60 = vpop.f32.mrf.mxu0 }
 0x169   :  { %504 = vst [vmem:[#allocation10 + $0x8] sm:$0xff] %v502_v61 }
 0x16a   :  { %839 = shalt.err (!%p836_p10)
}
 0x16b   :  { %s865_s16 = smov 128   ;;  %s866_s4 = smov 8  }
 0x16c   :  { %516 = dma.vmem_to_hbm [thread:$0]  %s511_s14, 256, %s1231_s5, [#allocation4], %s865_s16, %s865_s16, %s866_s4  }
 0x16d   :  { %854 = dma.done.wait [#allocation4], 256  }
 0x16e   :  { %855 = vsyncadd [#allocation4], 4294967040 }
 0x16f   :  { %520 = vsyncpa [#allocation3], 1 }
 0x170   :  { %521 = vsyncpa [#allocation6], 1 }
 0x171   :  { %522 = vsyncpa [#allocation9], 1 }
 0x172   :  { %523 = vsyncpa [#allocation4], 1 }

</bundles_post_ra>
